<compile_context>
chip_gen: v5e
topology: v5e:2x2
jax: 0.10.0
libtpu: 0.0.40
codegen_flags: <defaults>
</compile_context>

<pallas_src>
import functools
import math

import jax
import jax.numpy as jnp
from jax.experimental import pallas as pl
from jax.experimental.pallas import tpu as pltpu


# ----------------------------------------------------------------------------
# Pallas kernels
# ----------------------------------------------------------------------------
def _proj_stats_kernel(x_ref, w_ref, b_ref, y_ref, stats_ref):
    """Pass 1: y = x @ w + b (bf16 operands, f32 accumulate) on one spatial tile,
    plus per-group partial moments accumulated across the spatial ('arbitrary')
    grid axis.

    x_ref:     [1, tN, Cin]  bf16
    w_ref:     [Cin, Cout]   bf16
    b_ref:     [1, Cout]     f32
    y_ref:     [1, tN, Cout] f32   (projection output, consumed by pass 2)
    stats_ref: [1, 2, G]     f32   (row0 = sum(y), row1 = sum(y^2) per group;
                                    same block across the tile axis -> accumulator)
    """
    n = pl.program_id(1)
    x = x_ref[0]                                                     # [tN, Cin]
    y = jnp.dot(x, w_ref[...], preferred_element_type=jnp.float32) + b_ref[...]
    y_ref[0] = y

    cout = y.shape[1]
    g = stats_ref.shape[2]
    # Column reductions first (XLU sublane reduce), then a tiny [1,Cout]@[Cout,G]
    # contraction instead of two full [tN,Cout]@[Cout,G] matmuls.
    col_sum = jnp.sum(y, axis=0, keepdims=True)                      # [1, Cout]
    col_sq = jnp.sum(y * y, axis=0, keepdims=True)                   # [1, Cout]
    ch = jax.lax.broadcasted_iota(jnp.int32, (cout, g), 0)
    gi = jax.lax.broadcasted_iota(jnp.int32, (cout, g), 1)
    gind = (ch // (cout // g) == gi).astype(jnp.float32)             # [Cout, G]
    part = jnp.concatenate(
        [jnp.dot(col_sum, gind, preferred_element_type=jnp.float32),
         jnp.dot(col_sq, gind, preferred_element_type=jnp.float32)], axis=0)  # [2, G]

    @pl.when(n == 0)
    def _():
        stats_ref[0] = part

    @pl.when(n > 0)
    def _():
        stats_ref[0] = stats_ref[0] + part


def _gn_norm_kernel(y_ref, stats_ref, gamma_ref, beta_ref, o_ref, *, n_total):
    """Pass 2: GroupNorm normalize one spatial tile with the global group stats.

    y_ref:     [1, tN, Cout] f32
    stats_ref: [1, 2, G]     f32 (global sums for this batch element)
    gamma/beta:[1, Cout]
    o_ref:     [1, tN, Cout] f32
    """
    y = y_ref[0]                                                     # [tN, Cout]
    cout = y.shape[1]
    g = stats_ref.shape[2]
    cnt = jnp.float32(n_total * (cout // g))                         # elems / group
    st = stats_ref[0]                                                # [2, G]
    mean_g = st[0:1, :] / cnt
    var_g = jnp.maximum(st[1:2, :] / cnt - mean_g * mean_g, 0.0)     # clamp: no NaN
    ch = jax.lax.broadcasted_iota(jnp.int32, (cout, g), 0)
    gi = jax.lax.broadcasted_iota(jnp.int32, (cout, g), 1)
    gind = (ch // (cout // g) == gi).astype(jnp.float32)             # [Cout, G]
    mean_c = jax.lax.dot_general(mean_g, gind, (((1,), (1,)), ((), ())),
                                 preferred_element_type=jnp.float32)  # [1, Cout]
    var_c = jax.lax.dot_general(var_g, gind, (((1,), (1,)), ((), ())),
                                preferred_element_type=jnp.float32)   # [1, Cout]
    yn = (y - mean_c) * jax.lax.rsqrt(var_c + 1e-5)
    o_ref[0] = yn * gamma_ref[...] + beta_ref[...]


def _linear_kernel(x_ref, w_ref, b_ref, o_ref):
    o_ref[...] = (jnp.dot(x_ref[...], w_ref[...], preferred_element_type=jnp.float32)
                  + b_ref[...])


def _bbox_head_kernel(hs_ref, ref_ref, w1_ref, b1_ref, w2_ref, b2_ref,
                      w3_ref, b3_ref, o_ref):
    """3-layer MLP (ReLU) -> delta; out = sigmoid(delta + inverse_sigmoid(ref)).

    All decoder layers / batches / queries flattened into the M (row) axis.
    The coordinate axis is padded to 128 lanes (w3/b3/ref padded in wrapper)
    so the store is lane-dense; the wrapper slices [:, :4].
    """
    h = jnp.dot(hs_ref[...], w1_ref[...], preferred_element_type=jnp.float32) + b1_ref[...]
    h = jnp.maximum(h, 0.0).astype(jnp.bfloat16)
    h = jnp.dot(h, w2_ref[...], preferred_element_type=jnp.float32) + b2_ref[...]
    h = jnp.maximum(h, 0.0).astype(jnp.bfloat16)
    delta = jnp.dot(h, w3_ref[...], preferred_element_type=jnp.float32) + b3_ref[...]
    r = jnp.clip(ref_ref[...], 0.0, 1.0)
    r1 = jnp.maximum(r, 1e-3)
    r2 = jnp.maximum(1.0 - r, 1e-3)
    o_ref[...] = jax.nn.sigmoid(delta + jnp.log(r1 / r2))


def _contrastive_kernel(hs_ref, sup_ref, mask_ref, o_ref):
    """ContrastiveEmbed with fused padding: logits = hs @ support^T, -inf where
    the token is invalid OR is a pad column beyond the real support length.

    hs_ref:  [1, Q, D] bf16,  sup_ref: [1, Lmax, D] bf16 (zero-padded),
    mask_ref:[1, 1, Lmax] f32 (1.0 = valid),  o_ref: [1, Q, Lmax] f32.
    """
    q = hs_ref[0]                                                    # [Q, D]
    s = sup_ref[0]                                                   # [Lmax, D]
    logits = jax.lax.dot_general(q, s, (((1,), (1,)), ((), ())),
                                 preferred_element_type=jnp.float32)  # [Q, Lmax]
    m = mask_ref[0]                                                  # [1, Lmax]
    o_ref[0] = jnp.where(m > 0.5, logits, -jnp.inf)


# ----------------------------------------------------------------------------
# Pallas wrappers
# ----------------------------------------------------------------------------
_VMEM_LIMIT = 48 * 1024 * 1024   # explicit scoped-VMEM budget (safe on v5e/v6e/v7x)


def _spatial_tile(n):
    """Largest tile t <= ~512 with t % 8 == 0 and n % t == 0 (>= 2 steps if possible)."""
    target = 512 if n > 1024 else max(8, n // 2)
    t = min(n, target)
    t -= t % 8
    while t >= 8 and n % t != 0:
        t -= 8
    return t if (t >= 8 and n % t == 0) else n


def proj_gn_pallas(x_flat, w, b, gamma, beta, num_groups=32, n_tile=None):
    """x_flat: [B, N, Cin] -> [B, N, Cout]; conv-as-matmul + GroupNorm (two-pass)."""
    B, N, Cin = x_flat.shape
    Cout = w.shape[1]
    G = num_groups
    if n_tile is None:
        n_tile = _spatial_tile(N)
    assert N % n_tile == 0 and (n_tile % 8 == 0 or n_tile == N)
    n_steps = N // n_tile

    xb = x_flat.astype(jnp.bfloat16)
    wb = w.astype(jnp.bfloat16)
    b2 = b.reshape(1, Cout).astype(jnp.float32)

    flops1 = 2 * B * N * Cin * Cout
    bytes1 = (B * N * Cin * 2 + Cin * Cout * 2 + Cout * 4
              + B * N * Cout * 4 + B * 2 * G * 4)
    y, stats = pl.pallas_call(
        _proj_stats_kernel,
        out_shape=(jax.ShapeDtypeStruct((B, N, Cout), jnp.float32),
                   jax.ShapeDtypeStruct((B, 2, G), jnp.float32)),
        grid=(B, n_steps),
        in_specs=[pl.BlockSpec((1, n_tile, Cin), lambda bi, ni: (bi, ni, 0)),
                  pl.BlockSpec((Cin, Cout), lambda bi, ni: (0, 0)),
                  pl.BlockSpec((1, Cout), lambda bi, ni: (0, 0))],
        out_specs=(pl.BlockSpec((1, n_tile, Cout), lambda bi, ni: (bi, ni, 0)),
                   pl.BlockSpec((1, 2, G), lambda bi, ni: (bi, 0, 0))),
        compiler_params=pltpu.CompilerParams(
            dimension_semantics=("parallel", "arbitrary"),
            vmem_limit_bytes=_VMEM_LIMIT),
        cost_estimate=pl.CostEstimate(flops=flops1, transcendentals=0,
                                      bytes_accessed=bytes1),
    )(xb, wb, b2)

    flops2 = 6 * B * N * Cout
    bytes2 = 2 * B * N * Cout * 4 + B * 2 * G * 4 + 2 * Cout * 4
    out = pl.pallas_call(
        functools.partial(_gn_norm_kernel, n_total=N),
        out_shape=jax.ShapeDtypeStruct((B, N, Cout), jnp.float32),
        grid=(B, n_steps),
        in_specs=[pl.BlockSpec((1, n_tile, Cout), lambda bi, ni: (bi, ni, 0)),
                  pl.BlockSpec((1, 2, G), lambda bi, ni: (bi, 0, 0)),
                  pl.BlockSpec((1, Cout), lambda bi, ni: (0, 0)),
                  pl.BlockSpec((1, Cout), lambda bi, ni: (0, 0))],
        out_specs=pl.BlockSpec((1, n_tile, Cout), lambda bi, ni: (bi, ni, 0)),
        compiler_params=pltpu.CompilerParams(
            dimension_semantics=("parallel", "parallel"),
            vmem_limit_bytes=_VMEM_LIMIT),
        cost_estimate=pl.CostEstimate(flops=flops2, transcendentals=B * G,
                                      bytes_accessed=bytes2),
    )(y, stats, gamma.reshape(1, Cout).astype(jnp.float32),
      beta.reshape(1, Cout).astype(jnp.float32))
    return out


def linear_pallas(x, w, b):
    M, K = x.shape
    N = w.shape[1]
    return pl.pallas_call(
        _linear_kernel,
        out_shape=jax.ShapeDtypeStruct((M, N), jnp.float32),
        grid=(1,),
        in_specs=[pl.BlockSpec((M, K), lambda i: (0, 0)),
                  pl.BlockSpec((K, N), lambda i: (0, 0)),
                  pl.BlockSpec((1, N), lambda i: (0, 0))],
        out_specs=pl.BlockSpec((M, N), lambda i: (0, 0)),
    )(x.astype(jnp.bfloat16), w.astype(jnp.bfloat16),
      b.reshape(1, N).astype(jnp.float32))


def bbox_head_pallas(hs_all, ref_all, w1, b1, w2, b2, w3, b3):
    """hs_all: [M, D] (M = L*B*Q), ref_all: [M, 4] -> [M, 4] box coords."""
    M, D = hs_all.shape
    NP = 128   # lane-dense output width; coords live in the first 4 lanes
    ref_pad = jnp.full((M, NP), 0.5, jnp.float32).at[:, :4].set(ref_all)
    w3p = jnp.zeros((D, NP), jnp.float32).at[:, :4].set(w3).astype(jnp.bfloat16)
    b3p = jnp.zeros((1, NP), jnp.float32).at[0, :4].set(b3)
    tm = 32 if (M % 32 == 0 and M > 32) else M
    out = pl.pallas_call(
        _bbox_head_kernel,
        out_shape=jax.ShapeDtypeStruct((M, NP), jnp.float32),
        grid=(M // tm,),
        in_specs=[pl.BlockSpec((tm, D), lambda i: (i, 0)),
                  pl.BlockSpec((tm, NP), lambda i: (i, 0)),
                  pl.BlockSpec((D, D), lambda i: (0, 0)),
                  pl.BlockSpec((1, D), lambda i: (0, 0)),
                  pl.BlockSpec((D, D), lambda i: (0, 0)),
                  pl.BlockSpec((1, D), lambda i: (0, 0)),
                  pl.BlockSpec((D, NP), lambda i: (0, 0)),
                  pl.BlockSpec((1, NP), lambda i: (0, 0))],
        out_specs=pl.BlockSpec((tm, NP), lambda i: (i, 0)),
        compiler_params=pltpu.CompilerParams(dimension_semantics=("parallel",)),
    )(hs_all.astype(jnp.bfloat16), ref_pad,
      w1.astype(jnp.bfloat16), b1.reshape(1, D).astype(jnp.float32),
      w2.astype(jnp.bfloat16), b2.reshape(1, D).astype(jnp.float32),
      w3p, b3p)
    return out[:, :4]


def contrastive_pallas(hs_lb, sup_lb, mask_lb):
    """hs_lb: [L*B, Q, D] bf16, sup_lb: [L*B, Lmax, D] bf16 (zero-padded),
    mask_lb: [L*B, 1, Lmax] f32 (1=valid). Returns [L*B, Q, Lmax] f32 logits
    with -inf already written in masked / padded columns."""
    LB, Q, D = hs_lb.shape
    Lmax = sup_lb.shape[1]
    flops = 2 * LB * Q * Lmax * D
    bytes_acc = LB * (Q * D * 2 + Lmax * D * 2 + Lmax * 4 + Q * Lmax * 4)
    return pl.pallas_call(
        _contrastive_kernel,
        out_shape=jax.ShapeDtypeStruct((LB, Q, Lmax), jnp.float32),
        grid=(LB,),
        in_specs=[pl.BlockSpec((1, Q, D), lambda i: (i, 0, 0)),
                  pl.BlockSpec((1, Lmax, D), lambda i: (i, 0, 0)),
                  pl.BlockSpec((1, 1, Lmax), lambda i: (i, 0, 0))],
        out_specs=pl.BlockSpec((1, Q, Lmax), lambda i: (i, 0, 0)),
        compiler_params=pltpu.CompilerParams(dimension_semantics=("parallel",)),
        cost_estimate=pl.CostEstimate(flops=flops, transcendentals=0,
                                      bytes_accessed=bytes_acc),
    )(hs_lb, sup_lb, mask_lb)


# ----------------------------------------------------------------------------
# Plain-JAX glue (im2col, mask resize, positional embedding, transformer stub)
# ----------------------------------------------------------------------------
def im2col_3x3_s2(x_nchw):
    """3x3 / stride-2 / pad-1 patch extraction. Returns [B, Ho*Wo, 9*C], Ho, Wo.

    TODO(synk): at production resolutions this should be a fully in-kernel
    shifted-view conv (9 accumulated matmuls) to avoid materializing 9*C
    channels in HBM; here it is kept but done in bf16 to halve the traffic."""
    B, C, H, W = x_nchw.shape
    xp = jnp.pad(x_nchw, ((0, 0), (0, 0), (1, 1), (1, 1)))
    Ho = (H + 2 - 3) // 2 + 1
    Wo = (W + 2 - 3) // 2 + 1
    patches = []
    for di in range(3):
        for dj in range(3):
            patches.append(xp[:, :, di:di + 2 * Ho:2, dj:dj + 2 * Wo:2])  # [B,C,Ho,Wo]
    p = jnp.stack(patches, axis=1)                    # [B, 9, C, Ho, Wo]
    p = p.transpose(0, 3, 4, 1, 2).reshape(B, Ho * Wo, 9 * C)
    return p, Ho, Wo


def nearest_resize_mask(mask, out_hw):
    B, H, W = mask.shape
    Ho, Wo = out_hw
    ri = jnp.floor(jnp.arange(Ho) * (H / Ho)).astype(jnp.int32)
    ci = jnp.floor(jnp.arange(Wo) * (W / Wo)).astype(jnp.int32)
    return mask[:, ri][:, :, ci]


def sine_pos_embed(mask, num_pos_feats, temperature=10000.0):
    # TODO(synk): the real `position_embedding` module is external to TIDE;
    # this is a standard DETR-style sine embedding used only by the stub.
    not_mask = (~mask).astype(jnp.float32)
    y_embed = jnp.cumsum(not_mask, axis=1)
    x_embed = jnp.cumsum(not_mask, axis=2)
    eps = 1e-6
    scale = 2.0 * math.pi
    y_embed = y_embed / (y_embed[:, -1:, :] + eps) * scale
    x_embed = x_embed / (x_embed[:, :, -1:] + eps) * scale
    dim_t = jnp.arange(num_pos_feats, dtype=jnp.float32)
    dim_t = temperature ** (2.0 * jnp.floor(dim_t / 2.0) / num_pos_feats)
    pos_x = x_embed[..., None] / dim_t
    pos_y = y_embed[..., None] / dim_t
    B, H, W = mask.shape
    pos_x = jnp.stack([jnp.sin(pos_x[..., 0::2]), jnp.cos(pos_x[..., 1::2])],
                      axis=4).reshape(B, H, W, -1)
    pos_y = jnp.stack([jnp.sin(pos_y[..., 0::2]), jnp.cos(pos_y[..., 1::2])],
                      axis=4).reshape(B, H, W, -1)
    pos = jnp.concatenate([pos_y, pos_x], axis=3)     # [B, H, W, 2*num_pos_feats]
    return pos.transpose(0, 3, 1, 2)                  # NCHW, like PyTorch


def transformer_stub(srcs_flat, poss_flat, prompt_dict, num_layers, num_queries, ref_w):
    # TODO(synk): the deformable encoder/decoder `self.transformer` is an external
    # module not defined in TIDE; replaced with a deterministic surrogate that
    # produces hs [L, B, Q, D] and reference [L+1, B, Q, 4] with correct shapes.
    memory = jnp.concatenate([s + p for s, p in zip(srcs_flat, poss_flat)], axis=1)
    sup = prompt_dict["encoded_support"]
    vmask = prompt_dict["support_token_mask"].astype(jnp.float32)[..., None]
    pooled = (sup * vmask).sum(axis=1) / jnp.maximum(vmask.sum(axis=1), 1.0)
    q0 = memory[:, :num_queries, :] + pooled[:, None, :]
    hs = jnp.stack([jnp.tanh(q0 * (l + 1) / num_layers) for l in range(num_layers)])
    ref_list = [jax.nn.sigmoid(hs[0] @ ref_w)] + [jax.nn.sigmoid(hs[l] @ ref_w)
                                                  for l in range(num_layers)]
    reference = jnp.stack(ref_list)                   # [L+1, B, Q, 4]
    return hs, reference


# ----------------------------------------------------------------------------
# TIDE forward (JAX orchestration around the Pallas kernels)
# ----------------------------------------------------------------------------
def tide_forward(params, image_feats, prompt_feats, cfg):
    hidden = cfg["hidden_dim"]
    num_layers = cfg["num_decoder_layers"]
    num_queries = cfg["num_queries"]
    max_support_len = cfg["max_support_len"]

    # position embedding per backbone level
    poss = [sine_pos_embed(m, hidden // 2) for (_, m) in image_feats]

    # ---- prompt branch: permute(0,2,1) + feat_map Linear (Pallas matmul) ----
    p_tensors, p_masks = prompt_feats                 # [B, Pd, Lp], [B, Lp] (True=pad)
    B, PD, LP = p_tensors.shape
    x = p_tensors.transpose(0, 2, 1).reshape(B * LP, PD)
    enc_support = linear_pallas(x, params["feat_map_w"], params["feat_map_b"])
    enc_support = enc_support.reshape(B, LP, hidden)
    support_token_mask = ~p_masks                     # True = valid
    prompt_dict = {
        "encoded_support": enc_support,
        "support_token_mask": support_token_mask,
        "position_ids": None,
        "support_self_attention_masks": None,
    }

    # ---- extend_featlayer ----
    srcs, masks_l = [], []
    t0, m0 = image_feats[0]                           # NCHW, [B,H,W]
    _, C0, H0, W0 = t0.shape
    x0 = t0.transpose(0, 2, 3, 1).reshape(B, H0 * W0, C0)
    src0 = proj_gn_pallas(x0, params["proj0_w"], params["proj0_b"],
                          params["gn0_g"], params["gn0_bt"])
    srcs.append(src0)
    masks_l.append(m0)

    # extra level: Conv2d(3x3, stride 2, pad 1) + GroupNorm on raw backbone feature
    patches, H1, W1 = im2col_3x3_s2(t0.astype(jnp.bfloat16))   # bf16 im2col
    src1 = proj_gn_pallas(patches, params["proj1_w"], params["proj1_b"],
                          params["gn1_g"], params["gn1_bt"])
    m1 = nearest_resize_mask(m0, (H1, W1))
    pos1 = sine_pos_embed(m1, hidden // 2)
    srcs.append(src1)
    masks_l.append(m1)
    poss.append(pos1)

    # ---- transformer (stub) ----
    poss_flat = [p.transpose(0, 2, 3, 1).reshape(B, -1, hidden) for p in poss]
    hs, reference = transformer_stub(srcs, poss_flat, prompt_dict,
                                     num_layers, num_queries, params["ref_w"])

    # ---- bbox heads: ALL decoder layers in one Pallas call (fused MLP +
    #      inverse_sigmoid + sigmoid, lane-dense 128-wide output) ----
    M = num_layers * B * num_queries
    hs_all = hs[:num_layers].reshape(M, hidden)
    ref_all = reference[:num_layers].reshape(M, 4)
    coords = bbox_head_pallas(hs_all, ref_all,
                              params["bbox_w1"], params["bbox_b1"],
                              params["bbox_w2"], params["bbox_b2"],
                              params["bbox_w3"], params["bbox_b3"])
    outputs_coord = coords.reshape(num_layers, B, num_queries, 4)

    # ---- class heads: ContrastiveEmbed with fused -inf padding to
    #      max_support_len; decoder layers folded into the grid ----
    sup_pad = jnp.zeros((B, max_support_len, hidden), jnp.float32)
    sup_pad = sup_pad.at[:, :LP, :].set(enc_support)
    mask_pad = jnp.zeros((B, max_support_len), jnp.float32)
    mask_pad = mask_pad.at[:, :LP].set(support_token_mask.astype(jnp.float32))
    LB = num_layers * B
    hs_lb = hs.reshape(LB, num_queries, hidden).astype(jnp.bfloat16)
    sup_lb = jnp.broadcast_to(sup_pad[None], (num_layers, B, max_support_len, hidden)
                              ).reshape(LB, max_support_len, hidden).astype(jnp.bfloat16)
    mask_lb = jnp.broadcast_to(mask_pad[:, None, :][None],
                               (num_layers, B, 1, max_support_len)
                               ).reshape(LB, 1, max_support_len)
    logits = contrastive_pallas(hs_lb, sup_lb, mask_lb)
    outputs_class = logits.reshape(num_layers, B, num_queries, max_support_len)

    out = {"pred_logits": outputs_class[-1], "pred_boxes": outputs_coord[-1]}
    out["aux_outputs"] = [{"pred_logits": a, "pred_boxes": b}
                          for a, b in zip(outputs_class[:-1], outputs_coord[:-1])]
    return out


# ----------------------------------------------------------------------------
# Deterministic parameter init (mirrors TIDE.__init__ shapes / init schemes)
# ----------------------------------------------------------------------------
def init_params(key, cin, hidden, prompt_dim):
    ks = jax.random.split(key, 10)

    def xavier(k, shape, fan_in, fan_out):
        bound = math.sqrt(6.0 / (fan_in + fan_out))
        return jax.random.uniform(k, shape, jnp.float32, -bound, bound)

    def torch_linear(kw, kb, fan_in, shape_w, shape_b):
        bound = 1.0 / math.sqrt(fan_in)
        w = jax.random.uniform(kw, shape_w, jnp.float32, -bound, bound)
        b = jax.random.uniform(kb, shape_b, jnp.float32, -bound, bound)
        return w, b

    # input_proj[0]: Conv2d(cin, hidden, 1) + GroupNorm(32, hidden)
    proj0_w = xavier(ks[0], (cin, hidden), cin, hidden)            # 1x1 conv as [Cin,Cout]
    proj0_b = jnp.zeros((hidden,), jnp.float32)
    # input_proj[1]: Conv2d(cin, hidden, 3, stride=2, pad=1) + GroupNorm(32, hidden)
    conv1 = xavier(ks[1], (hidden, cin, 3, 3), cin * 9, hidden * 9)
    proj1_w = conv1.transpose(2, 3, 1, 0).reshape(9 * cin, hidden)  # matches im2col layout
    proj1_b = jnp.zeros((hidden,), jnp.float32)
    # feat_map: Linear(prompt_dim, hidden), xavier weight, zero bias
    feat_map_w = xavier(ks[2], (prompt_dim, hidden), prompt_dim, hidden)
    feat_map_b = jnp.zeros((hidden,), jnp.float32)
    # bbox MLP(hidden, hidden, 4, 3); last layer zero-initialized
    bbox_w1, bbox_b1 = torch_linear(ks[3], ks[4], hidden, (hidden, hidden), (hidden,))
    bbox_w2, bbox_b2 = torch_linear(ks[5], ks[6], hidden, (hidden, hidden), (hidden,))
    bbox_w3 = jnp.zeros((hidden, 4), jnp.float32)
    bbox_b3 = jnp.zeros((4,), jnp.float32)
    # transformer-stub reference projection
    ref_w = 0.1 * jax.random.normal(ks[7], (hidden, 4), jnp.float32)

    return {
        "proj0_w": proj0_w, "proj0_b": proj0_b,
        "gn0_g": jnp.ones((hidden,), jnp.float32), "gn0_bt": jnp.zeros((hidden,), jnp.float32),
        "proj1_w": proj1_w, "proj1_b": proj1_b,
        "gn1_g": jnp.ones((hidden,), jnp.float32), "gn1_bt": jnp.zeros((hidden,), jnp.float32),
        "feat_map_w": feat_map_w, "feat_map_b": feat_map_b,
        "bbox_w1": bbox_w1, "bbox_b1": bbox_b1,
        "bbox_w2": bbox_w2, "bbox_b2": bbox_b2,
        "bbox_w3": bbox_w3, "bbox_b3": bbox_b3,
        "ref_w": ref_w,
    }


# ----------------------------------------------------------------------------
if __name__ == "__main__":
    B = 2
    H = W = 8
    CIN = 768                 # backbone_num_channels = [192,384,768][4-2:] -> [768]
    HIDDEN = 128              # transformer.d_model (divisible by 32 for GroupNorm)
    PROMPT_DIM = 64           # train_config.prompt_feat_dim
    LP = 8                    # number of support/prompt tokens
    MAX_SUPPORT_LEN = 16      # args.max_support_len
    NUM_DEC_LAYERS = 2
    NUM_QUERIES = 16

    cfg = {
        "hidden_dim": HIDDEN,
        "num_feature_levels": 2,
        "max_support_len": MAX_SUPPORT_LEN,
        "num_decoder_layers": NUM_DEC_LAYERS,
        "num_queries": NUM_QUERIES,
        "two_stage_type": "standard",
    }

    key = jax.random.PRNGKey(0)
    k_img, k_prompt, k_params = jax.random.split(key, 3)

    img = jax.random.normal(k_img, (B, CIN, H, W), jnp.float32)     # NCHW backbone feature
    img_mask = jnp.zeros((B, H, W), dtype=bool)                     # True = padding
    prompt = jax.random.normal(k_prompt, (B, PROMPT_DIM, LP), jnp.float32)
    prompt_mask = jnp.zeros((B, LP), dtype=bool).at[1, LP - 2:].set(True)

    params = init_params(k_params, CIN, HIDDEN, PROMPT_DIM)

    out = tide_forward(params, [(img, img_mask)], (prompt, prompt_mask), cfg)
    jax.block_until_ready(out)

    assert out["pred_logits"].shape == (B, NUM_QUERIES, MAX_SUPPORT_LEN)
    assert out["pred_boxes"].shape == (B, NUM_QUERIES, 4)
    assert len(out["aux_outputs"]) == NUM_DEC_LAYERS - 1
    assert bool(jnp.isfinite(out["pred_boxes"]).all())
    print("KERNEL_OK")
</pallas_src>

<mosaic_0001>
module attributes {stable_mosaic.version = 11 : i64} {
  func.func @_linear_kernel(%arg0: i32, %arg1: memref<16x64xbf16, #tpu.memory_space<vmem>>, %arg2: memref<64x128xbf16, #tpu.memory_space<vmem>>, %arg3: memref<1x128xf32, #tpu.memory_space<vmem>>, %arg4: memref<16x128xf32, #tpu.memory_space<vmem>>) attributes {dimension_semantics = [#tpu.dimension_semantics<arbitrary>], iteration_bounds = array<i64: 1>, scalar_prefetch = 0 : i64, scratch_operands = 0 : i64, tpu.core_type = #tpu.core_type<tc>, window_params = [{pipeline_mode = #tpu.pipeline_mode<synchronous>, transform_indices = @transform_0, window_bounds = array<i64: 16, 64>}, {pipeline_mode = #tpu.pipeline_mode<synchronous>, transform_indices = @transform_1, window_bounds = array<i64: 64, 128>}, {pipeline_mode = #tpu.pipeline_mode<synchronous>, transform_indices = @transform_2, window_bounds = array<i64: 1, 128>}, {pipeline_mode = #tpu.pipeline_mode<synchronous>, transform_indices = @transform_3, window_bounds = array<i64: 16, 128>}]} {
    %c0 = arith.constant 0 : index
    %c0_0 = arith.constant 0 : index
    %0 = vector.load %arg1[%c0, %c0_0] : memref<16x64xbf16, #tpu.memory_space<vmem>>, vector<16x64xbf16>
    %c0_1 = arith.constant 0 : index
    %c0_2 = arith.constant 0 : index
    %1 = vector.load %arg2[%c0_1, %c0_2] : memref<64x128xbf16, #tpu.memory_space<vmem>>, vector<64x128xbf16>
    %cst = arith.constant dense<0.000000e+00> : vector<16x128xf32>
    %2 = tpu.matmul %0, %1, %cst {dimension_numbers = #tpu.dot_dimension_numbers<[1], [0], [0], [1], [0, 0, 1, 1], [], []>} : vector<16x64xbf16>, vector<64x128xbf16>, vector<16x128xf32> -> vector<16x128xf32>
    %c0_3 = arith.constant 0 : index
    %c0_4 = arith.constant 0 : index
    %3 = vector.load %arg3[%c0_3, %c0_4] : memref<1x128xf32, #tpu.memory_space<vmem>>, vector<1x128xf32>
    %4 = vector.broadcast %3 : vector<1x128xf32> to vector<16x128xf32>
    %5 = arith.addf %2, %4 : vector<16x128xf32>
    %c0_5 = arith.constant 0 : index
    %c0_6 = arith.constant 0 : index
    %6 = vector.load %arg4[%c0_5, %c0_6] : memref<16x128xf32, #tpu.memory_space<vmem>>, vector<16x128xf32>
    tpu.vector_store %arg4[%c0_5, %c0_6], %5 {strides = array<i32>} : memref<16x128xf32, #tpu.memory_space<vmem>>, vector<16x128xf32>,
    return
  }
  func.func @transform_0(%arg0: i32) -> (i32, i32) {
    %c0_i32 = arith.constant 0 : i32
    %c0_i32_0 = arith.constant 0 : i32
    %c0_i32_1 = arith.constant 0 : i32
    return %c0_i32, %c0_i32_0 : i32, i32
  }
  func.func @transform_1(%arg0: i32) -> (i32, i32) {
    %c0_i32 = arith.constant 0 : i32
    %c0_i32_0 = arith.constant 0 : i32
    %c0_i32_1 = arith.constant 0 : i32
    return %c0_i32, %c0_i32_0 : i32, i32
  }
  func.func @transform_2(%arg0: i32) -> (i32, i32) {
    %c0_i32 = arith.constant 0 : i32
    %c0_i32_0 = arith.constant 0 : i32
    %c0_i32_1 = arith.constant 0 : i32
    return %c0_i32, %c0_i32_0 : i32, i32
  }
  func.func @transform_3(%arg0: i32) -> (i32, i32) {
    %c0_i32 = arith.constant 0 : i32
    %c0_i32_0 = arith.constant 0 : i32
    %c0_i32_1 = arith.constant 0 : i32
    return %c0_i32, %c0_i32_0 : i32, i32
  }
}

</mosaic_0001>

<bundles_post_ra>
// kernel: tpu_custom_call.1
= control target key start
LH: loop header
LB: loop body
LE: loop exit
PB: predicated region body
PF: predicated region fallthrough
CT: control target
= control target key end

     0   :  { %8 = vsyncpa [#allocation3], 0  ;;  %s282_s0 = inlined_call_operand.hbm [shape: bf16[16,64], index: 0, kind: input, shape index: {}]   ;;  %s283_s1 = inlined_call_operand.hbm [shape: bf16[64,128], index: 1, kind: input, shape index: {}]   ;;  %s284_s2 = inlined_call_operand.vmem [shape: f32[1,128], index: 2, kind: input, shape index: {}]   ;;  %s285_s3 = inlined_call_operand.hbm [shape: f32[16,128], index: 3, kind: output, shape index: {}]  }
   0x1   :  { %9 = vsyncpa [#allocation6], 0 }
   0x2   :  { %10 = vsyncpa [#allocation4], 0  ;;  %s15_s14 = sshll.u32 %s282_s0, 4  ;;  %s243_s15 = smov [#allocation2]   ;;  %s16_s14 = int_to_ptr.hbm [resolvable:$true] %s15_s14 }
   0x3   :  { %s17_s16 = sshll.u32 %s243_s15, 4  ;;  %s28_s19 = sshll.u32 %s283_s1, 4  ;;  %s18_s16 = int_to_ptr.vmem [resolvable:$true] %s17_s16  ;;  %s29_s19 = int_to_ptr.hbm [resolvable:$true] %s28_s19 }
   0x4   :  { %s244_s20 = smov 64   ;;  %s245_s21 = smov 4  }
   0x5   :  { %23 = dma.hbm_to_vmem [thread:$0]  %s16_s14, 128, %s18_s16, [#allocation3], %s244_s20, %s244_s20, %s245_s21  }
   0x6   :  { %s246_s22 = smov [#allocation5]  }
   0x7   :  { %s30_s23 = sshll.u32 %s246_s22, 4  ;;  %s31_s23 = int_to_ptr.vmem [resolvable:$true] %s30_s23 }
   0x8   :  { %36 = dma.hbm_to_vmem [thread:$0]  %s29_s19, 512, %s31_s23, [#allocation6], %s244_s20, %s244_s20, %s245_s21  }
   0x9   :  { %237 = dma.done.wait [#allocation3], 128  }
   0xa   :  { %238 = vsyncadd [#allocation3], 4294967168 }
   0xb   :  { %239 = dma.done.wait [#allocation6], 512  }
   0xc   :  { %240 = vsyncadd [#allocation6], 4294966784  ;;  %v156_v0 = vld [vmem:[#allocation5 + $0x18] sm:$0xff]  ;;  %v155_v1 = vld [vmem:[#allocation5 + $0x10] sm:$0xff]  ;;  %vm91_vm0 = vcmask 523264   ;;  %s247_s24 = smov [#allocation7]  }
   0xd   :  { %99 = vmatpush.bf16.msra.mxu0 %v156_v0  ;;  %v154_v2 = vld [vmem:[#allocation5 + $0x8] sm:$0xff]  ;;  %v153_v3 = vld [vmem:[#allocation5] sm:$0xff]  ;;  %v152_v4 = vld [vmem:[#allocation2] sm:$0xff]  ;;  %s115_s25 = sshll.u32 %s247_s24, 4  ;;  %s117_s28 = sshll.u32 %s285_s3, 4  ;;  %s116_s25 = int_to_ptr.vmem [resolvable:$true] %s115_s25  ;;  %s118_s28 = int_to_ptr.hbm [resolvable:$true] %s117_s28 }
   0xe   :  { %v164_v5 = vld [vmem:[%s284_s2] ss:$0 sm:$0xff]  ;;  %s248_s29 = smov 128   ;;  %s249_s30 = smov 8  }
  0x11   :  { %100 = vmatpush.bf16.msra.mxu0 %v155_v1 }
  0x15   :  { %101 = vmatpush.bf16.msra.mxu0 %v154_v2 }
  0x19   :  { %102 = vmatpush.bf16.msra.mxu0 %v153_v3 }
  0x1c   :  { %151 = vmatmul.msk.bf16.vlgmr.msra.gmra.mxu0 %vm91_vm0, %v152_v4 }
  0x99   :  { %v104_v6 = vpop.f32.mrf.mxu0 }
  0x9a   :  { %v105_v7 = vadd.f32 %v164_v5, %v104_v6 }
  0x9c   :  { %109 = vst [vmem:[#allocation7] sm:$0xff] %v105_v7 }
  0xa1   :  { %v106_v8 = vpop.f32.mrf.mxu0 }
  0xa2   :  { %v107_v9 = vadd.f32 %v164_v5, %v106_v8 }
  0xa4   :  { %110 = vst [vmem:[#allocation7 + $0x8] sm:$0xff] %v107_v9 }
  0xa5   :  { %123 = dma.vmem_to_hbm [thread:$0]  %s116_s25, 256, %s118_s28, [#allocation4], %s248_s29, %s248_s29, %s249_s30  }
  0xa6   :  { %241 = dma.done.wait [#allocation4], 256  }
  0xa7   :  { %242 = vsyncadd [#allocation4], 4294967040 }
  0xa8   :  { %128 = vsyncpa [#allocation3], 1 }
  0xa9   :  { %129 = vsyncpa [#allocation6], 1 }
  0xaa   :  { %130 = vsyncpa [#allocation4], 1 }

</bundles_post_ra>
